<compile_context>
chip_gen: v7x
topology: tpu7x:2x2x1
jax: 0.10.0
libtpu: 0.0.40
codegen_flags: <defaults>
</compile_context>

<pallas_src>
import jax
import jax.numpy as jnp
from jax.experimental import pallas as pl
from jax.experimental.pallas import tpu as pltpu  # noqa: F401  (kept for TPU-specific tuning)

# ----------------------------- configuration -----------------------------
BATCH = 2
SEQ_LEN = 8
INPUT_DIM = 4
HIDDEN_DIM = 16                # -> GRU hidden = 2 * HIDDEN_DIM = 32
OUTPUT_DIM = 4
NUM_LAYERS = 2                 # wavefront scheme below assumes exactly 2 GRU layers
DROPOUT = 0.0
KERNEL_SIZE = 3
H2 = HIDDEN_DIM * 2            # GRU hidden size = 32
H3 = 3 * H2                    # per-layer fused gate width = 96
GW = 8 * H2                    # fused wave gate width = 256 (8 blocks of H2, 128-aligned pairs)
CW = KERNEL_SIZE * HIDDEN_DIM  # conv-head lane width = 48
OUT_LEN = 2 * KERNEL_SIZE - 1  # ConvT(len=1,K) -> K, ConvT(len=K,K) -> 2K-1 = 5
BN_EPS = 1e-5


# ----------------------------- fused kernel -----------------------------
def fused_generator_kernel(x_ref, hinit_ref, gru_ref, conv_ref, out_ref):
    """Whole GeneratorV2 forward. No grid; everything VMEM/vreg resident."""
    # ---- hoisted, off the serial chain ----
    w_big = gru_ref[0:2 * H2, :]                                     # (64, 256)
    w_ih0 = gru_ref[2 * H2:2 * H2 + INPUT_DIM, :]                    # (D, 256)
    b_row = gru_ref[2 * H2 + INPUT_DIM:2 * H2 + INPUT_DIM + 1, :]    # (1, 256) all biases

    # Layer-0 input projection for all T+1 waves, with every GRU bias folded in.
    gi0_all = jnp.dot(x_ref[...], w_ih0,
                      preferred_element_type=jnp.float32) + b_row    # ((T+1)*B, 256)

    lane = jax.lax.broadcasted_iota(jnp.int32, (BATCH, 2 * H2), 1)
    h1_init_mask = lane >= H2                                        # wave-0: keep h1 = noise[1]

    # ---- wavefront-interleaved recurrence: 9 waves instead of 16 serial GRU steps ----
    h = hinit_ref[...]                                               # (B, 64) = [h0 | h1]
    for w in range(SEQ_LEN + 1):                                     # fully unrolled
        big = jnp.dot(h, w_big, preferred_element_type=jnp.float32)  # ONE MXU push per wave
        pre = big + gi0_all[w * BATCH:(w + 1) * BATCH, :]            # (B, 256)
        rz = jax.nn.sigmoid(pre[:, 0:4 * H2])                        # [r0|r1|z0|z1], one EUP sweep
        r = rz[:, 0:2 * H2]
        z = rz[:, 2 * H2:4 * H2]
        # PyTorch GRU: n = tanh(gi_n + r * (gh_n + b_hn)); b_hn is packed into the gh_n lanes.
        n = jnp.tanh(pre[:, 6 * H2:8 * H2] + r * pre[:, 4 * H2:6 * H2])   # [n0|n1]
        h_new = (1.0 - z) * n + z * h                                # -> [h0_w | h1_{w-1}]
        if w == 0:                                                   # layer-1 hasn't started yet
            h_new = jnp.where(h1_init_mask, h, h_new)
        h = h_new

    h_last = h[:, H2:2 * H2]           # layer-1 hidden at t = T-1  == GRU output[:, -1, :]

    # ---- conv head: ConvT(H2->hidden,K) as one matmul, BatchNorm1d (batch stats, biased var),
    #      LeakyReLU(slope=1.0)==identity, ConvT(hidden->out,K) as one block-Toeplitz matmul, tanh.
    w1 = conv_ref[0:H2, :]                                           # (32, 48)
    y = jnp.dot(h_last, w1, preferred_element_type=jnp.float32)      # (B, 48): K taps x 16 ch
    inv_cnt = 1.0 / float(BATCH * KERNEL_SIZE)
    mu = jnp.sum(y[:, 0:HIDDEN_DIM] + y[:, HIDDEN_DIM:2 * HIDDEN_DIM]
                 + y[:, 2 * HIDDEN_DIM:3 * HIDDEN_DIM],
                 axis=0, keepdims=True) * inv_cnt                    # (1, 16)
    mu3 = jnp.concatenate([mu, mu, mu], axis=-1)                     # (1, 48)
    d = y - mu3
    dsq = d * d
    var = jnp.sum(dsq[:, 0:HIDDEN_DIM] + dsq[:, HIDDEN_DIM:2 * HIDDEN_DIM]
                  + dsq[:, 2 * HIDDEN_DIM:3 * HIDDEN_DIM],
                  axis=0, keepdims=True) * inv_cnt                   # (1, 16) biased variance
    gamma = conv_ref[H2 + CW:H2 + CW + 1, 0:HIDDEN_DIM]              # (1, 16)
    beta = conv_ref[H2 + CW + 1:H2 + CW + 2, 0:HIDDEN_DIM]           # (1, 16)
    scale = gamma * jax.lax.rsqrt(var + BN_EPS)
    scale3 = jnp.concatenate([scale, scale, scale], axis=-1)         # (1, 48)
    beta3 = jnp.concatenate([beta, beta, beta], axis=-1)
    ybn = d * scale3 + beta3                                         # LeakyReLU(1.0) == identity
    w2 = conv_ref[H2:H2 + CW, 0:OUT_LEN * OUTPUT_DIM]                # (48, 20) block-Toeplitz
    out_ref[...] = jnp.tanh(jnp.dot(ybn, w2, preferred_element_type=jnp.float32))


# ----------------------------- wrapper -----------------------------
@jax.jit
def generator_v2_forward(packed, x, noise):
    """x: (B, T, input_dim) batch-first; noise: (num_layers, B, 2*hidden) GRU initial hidden."""
    B, T, D = x.shape
    x_tm = jnp.transpose(x, (1, 0, 2)).reshape(T * B, D)             # time-major rows: t*B + b
    x_pad = jnp.concatenate([x_tm, jnp.zeros((B, D), x.dtype)], axis=0)  # extra row-block for wave T
    h_init = jnp.concatenate([noise[0], noise[1]], axis=-1)          # (B, 2*H2) = [h0 | h1]
    out_flat = pl.pallas_call(
        fused_generator_kernel,
        out_shape=jax.ShapeDtypeStruct((B, OUT_LEN * OUTPUT_DIM), jnp.float32),
    )(x_pad, h_init, packed["gru_pack"], packed["conv_pack"])
    out = out_flat.reshape(B, OUT_LEN, OUTPUT_DIM)
    return jnp.transpose(out, (0, 2, 1))                             # (B, output_dim, 2K-1), NCL


# ----------------------------- parameter construction / packing -----------------------------
def build_toeplitz_taps(w2):
    """w2: (K, hidden, out) ConvT taps -> (K, hidden, L*out) block-Toeplitz tap matrices."""
    K, Hc, O = w2.shape
    L = 2 * K - 1
    taps = []
    for j in range(K):
        cols = []
        for t in range(L):
            k = t - j
            cols.append(w2[k] if 0 <= k < K else jnp.zeros((Hc, O), w2.dtype))
        taps.append(jnp.concatenate(cols, axis=1))                   # (hidden, L*out)
    return jnp.stack(taps, axis=0)


def init_params(key):
    params = {"gru": []}
    for l in range(NUM_LAYERS):
        d_in = INPUT_DIM if l == 0 else H2
        key, k1, k2, k3, k4 = jax.random.split(key, 5)
        # Gate-fused layouts, columns ordered [r | z | n] (PyTorch order).
        w_ih = 0.1 * jax.random.normal(k1, (d_in, H3), jnp.float32)
        w_hh = 0.1 * jax.random.normal(k2, (H2, H3), jnp.float32)
        b_ih = 0.1 * jax.random.normal(k3, (1, H3), jnp.float32)
        b_hh = 0.1 * jax.random.normal(k4, (1, H3), jnp.float32)
        params["gru"].append((w_ih, w_hh, b_ih, b_hh))
    key, k1, k2, k3, k4 = jax.random.split(key, 5)
    params["w1"] = 0.1 * jax.random.normal(k1, (KERNEL_SIZE, H2, HIDDEN_DIM), jnp.float32)
    params["w2"] = 0.1 * jax.random.normal(k2, (KERNEL_SIZE, HIDDEN_DIM, OUTPUT_DIM), jnp.float32)
    params["gamma"] = 1.0 + 0.1 * jax.random.normal(k3, (1, HIDDEN_DIM), jnp.float32)
    params["beta"] = 0.1 * jax.random.normal(k4, (1, HIDDEN_DIM), jnp.float32)
    return params


def pack_params(params):
    """Build the two packed weight slabs (one-time, zero runtime cost).

    gru_pack (2*H2 + D + 1, 8*H2): rows 0:64 = W_big, rows 64:68 = Wih0_ext, row 68 = all biases.
    Lane layout (8 blocks of H2): [ r0 | r1 | z0 | z1 | gh_n0 | gh_n1 | gi_n0 | gi_n1 ];
    layer-1 r/z columns pre-sum gi1+gh1 (Wih1 on the h0 rows, Whh1 on the h1 rows).
    conv_pack (H2 + CW + 2, CW): rows 0:32 = w1_flat, rows 32:80 = w2 block-Toeplitz (padded),
    row 80 = gamma, row 81 = beta.
    """
    (wih0, whh0, bih0, bhh0), (wih1, whh1, bih1, bhh1) = params["gru"]
    g = lambda m, i: m[:, i * H2:(i + 1) * H2]
    zh = jnp.zeros((H2, H2), jnp.float32)
    zx = jnp.zeros((INPUT_DIM, H2), jnp.float32)

    w_big = jnp.concatenate([
        jnp.concatenate([g(whh0, 0), g(wih1, 0), g(whh0, 1), g(wih1, 1),
                         g(whh0, 2), zh,         zh,         g(wih1, 2)], axis=1),   # h0 rows
        jnp.concatenate([zh,         g(whh1, 0), zh,         g(whh1, 1),
                         zh,         g(whh1, 2), zh,         zh        ], axis=1),   # h1 rows
    ], axis=0)                                                       # (64, 256)
    wih0_ext = jnp.concatenate([g(wih0, 0), zx, g(wih0, 1), zx,
                                zx, zx, g(wih0, 2), zx], axis=1)     # (D, 256)
    b_row = jnp.concatenate([
        g(bih0, 0) + g(bhh0, 0), g(bih1, 0) + g(bhh1, 0),
        g(bih0, 1) + g(bhh0, 1), g(bih1, 1) + g(bhh1, 1),
        g(bhh0, 2), g(bhh1, 2), g(bih0, 2), g(bih1, 2)], axis=1)     # (1, 256)
    gru_pack = jnp.concatenate([w_big, wih0_ext, b_row], axis=0)     # (69, 256)

    w1_flat = jnp.concatenate([params["w1"][k] for k in range(KERNEL_SIZE)], axis=1)  # (32, 48)
    taps = build_toeplitz_taps(params["w2"])                         # (K, 16, 20)
    w2_flat = jnp.concatenate([taps[j] for j in range(KERNEL_SIZE)], axis=0)          # (48, 20)
    w2_pad = jnp.pad(w2_flat, ((0, 0), (0, CW - OUT_LEN * OUTPUT_DIM)))
    gb_pad = jnp.pad(jnp.concatenate([params["gamma"], params["beta"]], axis=0),
                     ((0, 0), (0, CW - HIDDEN_DIM)))
    conv_pack = jnp.concatenate([w1_flat, w2_pad, gb_pad], axis=0)   # (82, 48)
    return {"gru_pack": gru_pack, "conv_pack": conv_pack}


# ----------------------------- pure-JAX reference (sanity check) -----------------------------
def reference_forward(params, x, noise):
    B, T, _ = x.shape
    seq = x
    for l in range(NUM_LAYERS):
        w_ih, w_hh, b_ih, b_hh = params["gru"][l]
        h = noise[l]
        outs = []
        for t in range(T):
            xt = seq[:, t, :]
            gi = xt @ w_ih + b_ih
            gh = h @ w_hh + b_hh
            r = jax.nn.sigmoid(gi[:, :H2] + gh[:, :H2])
            z = jax.nn.sigmoid(gi[:, H2:2 * H2] + gh[:, H2:2 * H2])
            n = jnp.tanh(gi[:, 2 * H2:] + r * gh[:, 2 * H2:])
            h = (1.0 - z) * n + z * h
            outs.append(h)
        seq = jnp.stack(outs, axis=1)
    h_last = seq[:, -1, :]
    y1 = jnp.einsum("bi,kio->bok", h_last, params["w1"])             # (B, hidden, K)
    mu = jnp.mean(y1, axis=(0, 2), keepdims=True)
    var = jnp.mean((y1 - mu) ** 2, axis=(0, 2), keepdims=True)
    ybn = (params["gamma"].reshape(1, -1, 1) * (y1 - mu) * jax.lax.rsqrt(var + BN_EPS)
           + params["beta"].reshape(1, -1, 1))
    y2 = jnp.zeros((B, OUTPUT_DIM, OUT_LEN), jnp.float32)
    for j in range(KERNEL_SIZE):
        for k in range(KERNEL_SIZE):
            y2 = y2.at[:, :, j + k].add(ybn[:, :, j] @ params["w2"][k])
    return jnp.tanh(y2)


# ----------------------------- main -----------------------------
if __name__ == "__main__":
    key = jax.random.PRNGKey(0)
    k_params, k_x, k_noise = jax.random.split(key, 3)

    params = init_params(k_params)
    packed = pack_params(params)
    x = jax.random.normal(k_x, (BATCH, SEQ_LEN, INPUT_DIM), jnp.float32)
    noise = jax.random.normal(k_noise, (NUM_LAYERS, BATCH, H2), jnp.float32)  # GRU initial hidden

    out = generator_v2_forward(packed, x, noise)
    out = jax.block_until_ready(out)

    assert out.shape == (BATCH, OUTPUT_DIM, OUT_LEN), out.shape
    ref = reference_forward(params, x, noise)
    max_err = float(jnp.max(jnp.abs(out - ref)))
    assert jnp.allclose(out, ref, atol=1e-3, rtol=1e-3), max_err

    print("KERNEL_OK")
</pallas_src>

<mosaic_0001>
module attributes {stable_mosaic.version = 11 : i64} {
  func.func @fused_generator_kernel(%arg0: memref<18x4xf32, #tpu.memory_space<vmem>>, %arg1: memref<2x64xf32, #tpu.memory_space<vmem>>, %arg2: memref<69x256xf32, #tpu.memory_space<vmem>>, %arg3: memref<82x48xf32, #tpu.memory_space<vmem>>, %arg4: memref<2x20xf32, #tpu.memory_space<vmem>>) attributes {dimension_semantics = [], scalar_prefetch = 0 : i64, scratch_operands = 0 : i64, tpu.core_type = #tpu.core_type<tc>} {
    %c0 = arith.constant 0 : index
    %c0_0 = arith.constant 0 : index
    %0 = vector.load %arg2[%c0, %c0_0] : memref<69x256xf32, #tpu.memory_space<vmem>>, vector<64x256xf32>
    %c64 = arith.constant 64 : index
    %c0_1 = arith.constant 0 : index
    %1 = vector.load %arg2[%c64, %c0_1] : memref<69x256xf32, #tpu.memory_space<vmem>>, vector<4x256xf32>
    %c68 = arith.constant 68 : index
    %c0_2 = arith.constant 0 : index
    %2 = vector.load %arg2[%c68, %c0_2] : memref<69x256xf32, #tpu.memory_space<vmem>>, vector<1x256xf32>
    %c0_3 = arith.constant 0 : index
    %c0_4 = arith.constant 0 : index
    %3 = vector.load %arg0[%c0_3, %c0_4] : memref<18x4xf32, #tpu.memory_space<vmem>>, vector<18x4xf32>
    %cst = arith.constant dense<0.000000e+00> : vector<18x256xf32>
    %4 = tpu.matmul %3, %1, %cst {dimension_numbers = #tpu.dot_dimension_numbers<[1], [0], [0], [1], [0, 0, 1, 1], [], []>} : vector<18x4xf32>, vector<4x256xf32>, vector<18x256xf32> -> vector<18x256xf32>
    %5 = vector.broadcast %2 : vector<1x256xf32> to vector<18x256xf32>
    %6 = arith.addf %4, %5 : vector<18x256xf32>
    %7 = tpu.iota {dimensions = array<i32: 1>} : vector<2x64xi32>
    %c32_i32 = arith.constant 32 : i32
    %8 = vector.broadcast %c32_i32 : i32 to vector<2x64xi32>
    %9 = arith.cmpi sge, %7, %8 : vector<2x64xi32>
    %c0_5 = arith.constant 0 : index
    %c0_6 = arith.constant 0 : index
    %10 = vector.load %arg1[%c0_5, %c0_6] : memref<2x64xf32, #tpu.memory_space<vmem>>, vector<2x64xf32>
    %cst_7 = arith.constant dense<0.000000e+00> : vector<2x256xf32>
    %11 = tpu.matmul %10, %0, %cst_7 {dimension_numbers = #tpu.dot_dimension_numbers<[1], [0], [0], [1], [0, 0, 1, 1], [], []>} : vector<2x64xf32>, vector<64x256xf32>, vector<2x256xf32> -> vector<2x256xf32>
    %12 = vector.extract_strided_slice %6 {offsets = [0, 0], sizes = [2, 256], strides = [1, 1]} : vector<18x256xf32> to vector<2x256xf32>
    %13 = arith.addf %11, %12 : vector<2x256xf32>
    %14 = vector.extract_strided_slice %13 {offsets = [0, 0], sizes = [2, 128], strides = [1, 1]} : vector<2x256xf32> to vector<2x128xf32>
    %15 = arith.negf %14 : vector<2x128xf32>
    %16 = math.exp %15 : vector<2x128xf32>
    %cst_8 = arith.constant 1.000000e+00 : f32
    %17 = vector.broadcast %cst_8 : f32 to vector<2x128xf32>
    %18 = arith.addf %17, %16 : vector<2x128xf32>
    %19 = arith.divf %17, %18 : vector<2x128xf32>
    %20 = vector.extract_strided_slice %19 {offsets = [0, 0], sizes = [2, 64], strides = [1, 1]} : vector<2x128xf32> to vector<2x64xf32>
    %21 = vector.extract_strided_slice %19 {offsets = [0, 64], sizes = [2, 64], strides = [1, 1]} : vector<2x128xf32> to vector<2x64xf32>
    %22 = vector.extract_strided_slice %13 {offsets = [0, 192], sizes = [2, 64], strides = [1, 1]} : vector<2x256xf32> to vector<2x64xf32>
    %23 = vector.extract_strided_slice %13 {offsets = [0, 128], sizes = [2, 64], strides = [1, 1]} : vector<2x256xf32> to vector<2x64xf32>
    %24 = arith.mulf %20, %23 : vector<2x64xf32>
    %25 = arith.addf %22, %24 : vector<2x64xf32>
    %26 = math.tanh %25 : vector<2x64xf32>
    %cst_9 = arith.constant 1.000000e+00 : f32
    %27 = vector.broadcast %cst_9 : f32 to vector<2x64xf32>
    %28 = arith.subf %27, %21 : vector<2x64xf32>
    %29 = arith.mulf %28, %26 : vector<2x64xf32>
    %30 = arith.mulf %21, %10 : vector<2x64xf32>
    %31 = arith.addf %29, %30 : vector<2x64xf32>
    %32 = arith.select %9, %10, %31 : vector<2x64xi1>, vector<2x64xf32>
    %cst_10 = arith.constant dense<0.000000e+00> : vector<2x256xf32>
    %33 = tpu.matmul %32, %0, %cst_10 {dimension_numbers = #tpu.dot_dimension_numbers<[1], [0], [0], [1], [0, 0, 1, 1], [], []>} : vector<2x64xf32>, vector<64x256xf32>, vector<2x256xf32> -> vector<2x256xf32>
    %34 = vector.extract_strided_slice %6 {offsets = [2, 0], sizes = [2, 256], strides = [1, 1]} : vector<18x256xf32> to vector<2x256xf32>
    %35 = arith.addf %33, %34 : vector<2x256xf32>
    %36 = vector.extract_strided_slice %35 {offsets = [0, 0], sizes = [2, 128], strides = [1, 1]} : vector<2x256xf32> to vector<2x128xf32>
    %37 = arith.negf %36 : vector<2x128xf32>
    %38 = math.exp %37 : vector<2x128xf32>
    %cst_11 = arith.constant 1.000000e+00 : f32
    %39 = vector.broadcast %cst_11 : f32 to vector<2x128xf32>
    %40 = arith.addf %39, %38 : vector<2x128xf32>
    %41 = arith.divf %39, %40 : vector<2x128xf32>
    %42 = vector.extract_strided_slice %41 {offsets = [0, 0], sizes = [2, 64], strides = [1, 1]} : vector<2x128xf32> to vector<2x64xf32>
    %43 = vector.extract_strided_slice %41 {offsets = [0, 64], sizes = [2, 64], strides = [1, 1]} : vector<2x128xf32> to vector<2x64xf32>
    %44 = vector.extract_strided_slice %35 {offsets = [0, 192], sizes = [2, 64], strides = [1, 1]} : vector<2x256xf32> to vector<2x64xf32>
    %45 = vector.extract_strided_slice %35 {offsets = [0, 128], sizes = [2, 64], strides = [1, 1]} : vector<2x256xf32> to vector<2x64xf32>
    %46 = arith.mulf %42, %45 : vector<2x64xf32>
    %47 = arith.addf %44, %46 : vector<2x64xf32>
    %48 = math.tanh %47 : vector<2x64xf32>
    %cst_12 = arith.constant 1.000000e+00 : f32
    %49 = vector.broadcast %cst_12 : f32 to vector<2x64xf32>
    %50 = arith.subf %49, %43 : vector<2x64xf32>
    %51 = arith.mulf %50, %48 : vector<2x64xf32>
    %52 = arith.mulf %43, %32 : vector<2x64xf32>
    %53 = arith.addf %51, %52 : vector<2x64xf32>
    %cst_13 = arith.constant dense<0.000000e+00> : vector<2x256xf32>
    %54 = tpu.matmul %53, %0, %cst_13 {dimension_numbers = #tpu.dot_dimension_numbers<[1], [0], [0], [1], [0, 0, 1, 1], [], []>} : vector<2x64xf32>, vector<64x256xf32>, vector<2x256xf32> -> vector<2x256xf32>
    %55 = vector.extract_strided_slice %6 {offsets = [4, 0], sizes = [2, 256], strides = [1, 1]} : vector<18x256xf32> to vector<2x256xf32>
    %56 = arith.addf %54, %55 : vector<2x256xf32>
    %57 = vector.extract_strided_slice %56 {offsets = [0, 0], sizes = [2, 128], strides = [1, 1]} : vector<2x256xf32> to vector<2x128xf32>
    %58 = arith.negf %57 : vector<2x128xf32>
    %59 = math.exp %58 : vector<2x128xf32>
    %cst_14 = arith.constant 1.000000e+00 : f32
    %60 = vector.broadcast %cst_14 : f32 to vector<2x128xf32>
    %61 = arith.addf %60, %59 : vector<2x128xf32>
    %62 = arith.divf %60, %61 : vector<2x128xf32>
    %63 = vector.extract_strided_slice %62 {offsets = [0, 0], sizes = [2, 64], strides = [1, 1]} : vector<2x128xf32> to vector<2x64xf32>
    %64 = vector.extract_strided_slice %62 {offsets = [0, 64], sizes = [2, 64], strides = [1, 1]} : vector<2x128xf32> to vector<2x64xf32>
    %65 = vector.extract_strided_slice %56 {offsets = [0, 192], sizes = [2, 64], strides = [1, 1]} : vector<2x256xf32> to vector<2x64xf32>
    %66 = vector.extract_strided_slice %56 {offsets = [0, 128], sizes = [2, 64], strides = [1, 1]} : vector<2x256xf32> to vector<2x64xf32>
    %67 = arith.mulf %63, %66 : vector<2x64xf32>
    %68 = arith.addf %65, %67 : vector<2x64xf32>
    %69 = math.tanh %68 : vector<2x64xf32>
    %cst_15 = arith.constant 1.000000e+00 : f32
    %70 = vector.broadcast %cst_15 : f32 to vector<2x64xf32>
    %71 = arith.subf %70, %64 : vector<2x64xf32>
    %72 = arith.mulf %71, %69 : vector<2x64xf32>
    %73 = arith.mulf %64, %53 : vector<2x64xf32>
    %74 = arith.addf %72, %73 : vector<2x64xf32>
    %cst_16 = arith.constant dense<0.000000e+00> : vector<2x256xf32>
    %75 = tpu.matmul %74, %0, %cst_16 {dimension_numbers = #tpu.dot_dimension_numbers<[1], [0], [0], [1], [0, 0, 1, 1], [], []>} : vector<2x64xf32>, vector<64x256xf32>, vector<2x256xf32> -> vector<2x256xf32>
    %76 = vector.extract_strided_slice %6 {offsets = [6, 0], sizes = [2, 256], strides = [1, 1]} : vector<18x256xf32> to vector<2x256xf32>
    %77 = arith.addf %75, %76 : vector<2x256xf32>
    %78 = vector.extract_strided_slice %77 {offsets = [0, 0], sizes = [2, 128], strides = [1, 1]} : vector<2x256xf32> to vector<2x128xf32>
    %79 = arith.negf %78 : vector<2x128xf32>
    %80 = math.exp %79 : vector<2x128xf32>
    %cst_17 = arith.constant 1.000000e+00 : f32
    %81 = vector.broadcast %cst_17 : f32 to vector<2x128xf32>
    %82 = arith.addf %81, %80 : vector<2x128xf32>
    %83 = arith.divf %81, %82 : vector<2x128xf32>
    %84 = vector.extract_strided_slice %83 {offsets = [0, 0], sizes = [2, 64], strides = [1, 1]} : vector<2x128xf32> to vector<2x64xf32>
    %85 = vector.extract_strided_slice %83 {offsets = [0, 64], sizes = [2, 64], strides = [1, 1]} : vector<2x128xf32> to vector<2x64xf32>
    %86 = vector.extract_strided_slice %77 {offsets = [0, 192], sizes = [2, 64], strides = [1, 1]} : vector<2x256xf32> to vector<2x64xf32>
    %87 = vector.extract_strided_slice %77 {offsets = [0, 128], sizes = [2, 64], strides = [1, 1]} : vector<2x256xf32> to vector<2x64xf32>
    %88 = arith.mulf %84, %87 : vector<2x64xf32>
    %89 = arith.addf %86, %88 : vector<2x64xf32>
    %90 = math.tanh %89 : vector<2x64xf32>
    %cst_18 = arith.constant 1.000000e+00 : f32
    %91 = vector.broadcast %cst_18 : f32 to vector<2x64xf32>
    %92 = arith.subf %91, %85 : vector<2x64xf32>
    %93 = arith.mulf %92, %90 : vector<2x64xf32>
    %94 = arith.mulf %85, %74 : vector<2x64xf32>
    %95 = arith.addf %93, %94 : vector<2x64xf32>
    %cst_19 = arith.constant dense<0.000000e+00> : vector<2x256xf32>
    %96 = tpu.matmul %95, %0, %cst_19 {dimension_numbers = #tpu.dot_dimension_numbers<[1], [0], [0], [1], [0, 0, 1, 1], [], []>} : vector<2x64xf32>, vector<64x256xf32>, vector<2x256xf32> -> vector<2x256xf32>
    %97 = vector.extract_strided_slice %6 {offsets = [8, 0], sizes = [2, 256], strides = [1, 1]} : vector<18x256xf32> to vector<2x256xf32>
    %98 = arith.addf %96, %97 : vector<2x256xf32>
    %99 = vector.extract_strided_slice %98 {offsets = [0, 0], sizes = [2, 128], strides = [1, 1]} : vector<2x256xf32> to vector<2x128xf32>
    %100 = arith.negf %99 : vector<2x128xf32>
    %101 = math.exp %100 : vector<2x128xf32>
    %cst_20 = arith.constant 1.000000e+00 : f32
    %102 = vector.broadcast %cst_20 : f32 to vector<2x128xf32>
    %103 = arith.addf %102, %101 : vector<2x128xf32>
    %104 = arith.divf %102, %103 : vector<2x128xf32>
    %105 = vector.extract_strided_slice %104 {offsets = [0, 0], sizes = [2, 64], strides = [1, 1]} : vector<2x128xf32> to vector<2x64xf32>
    %106 = vector.extract_strided_slice %104 {offsets = [0, 64], sizes = [2, 64], strides = [1, 1]} : vector<2x128xf32> to vector<2x64xf32>
    %107 = vector.extract_strided_slice %98 {offsets = [0, 192], sizes = [2, 64], strides = [1, 1]} : vector<2x256xf32> to vector<2x64xf32>
    %108 = vector.extract_strided_slice %98 {offsets = [0, 128], sizes = [2, 64], strides = [1, 1]} : vector<2x256xf32> to vector<2x64xf32>
    %109 = arith.mulf %105, %108 : vector<2x64xf32>
    %110 = arith.addf %107, %109 : vector<2x64xf32>
    %111 = math.tanh %110 : vector<2x64xf32>
    %cst_21 = arith.constant 1.000000e+00 : f32
    %112 = vector.broadcast %cst_21 : f32 to vector<2x64xf32>
    %113 = arith.subf %112, %106 : vector<2x64xf32>
    %114 = arith.mulf %113, %111 : vector<2x64xf32>
    %115 = arith.mulf %106, %95 : vector<2x64xf32>
    %116 = arith.addf %114, %115 : vector<2x64xf32>
    %cst_22 = arith.constant dense<0.000000e+00> : vector<2x256xf32>
    %117 = tpu.matmul %116, %0, %cst_22 {dimension_numbers = #tpu.dot_dimension_numbers<[1], [0], [0], [1], [0, 0, 1, 1], [], []>} : vector<2x64xf32>, vector<64x256xf32>, vector<2x256xf32> -> vector<2x256xf32>
    %118 = vector.extract_strided_slice %6 {offsets = [10, 0], sizes = [2, 256], strides = [1, 1]} : vector<18x256xf32> to vector<2x256xf32>
    %119 = arith.addf %117, %118 : vector<2x256xf32>
    %120 = vector.extract_strided_slice %119 {offsets = [0, 0], sizes = [2, 128], strides = [1, 1]} : vector<2x256xf32> to vector<2x128xf32>
    %121 = arith.negf %120 : vector<2x128xf32>
    %122 = math.exp %121 : vector<2x128xf32>
    %cst_23 = arith.constant 1.000000e+00 : f32
    %123 = vector.broadcast %cst_23 : f32 to vector<2x128xf32>
    %124 = arith.addf %123, %122 : vector<2x128xf32>
    %125 = arith.divf %123, %124 : vector<2x128xf32>
    %126 = vector.extract_strided_slice %125 {offsets = [0, 0], sizes = [2, 64], strides = [1, 1]} : vector<2x128xf32> to vector<2x64xf32>
    %127 = vector.extract_strided_slice %125 {offsets = [0, 64], sizes = [2, 64], strides = [1, 1]} : vector<2x128xf32> to vector<2x64xf32>
    %128 = vector.extract_strided_slice %119 {offsets = [0, 192], sizes = [2, 64], strides = [1, 1]} : vector<2x256xf32> to vector<2x64xf32>
    %129 = vector.extract_strided_slice %119 {offsets = [0, 128], sizes = [2, 64], strides = [1, 1]} : vector<2x256xf32> to vector<2x64xf32>
    %130 = arith.mulf %126, %129 : vector<2x64xf32>
    %131 = arith.addf %128, %130 : vector<2x64xf32>
    %132 = math.tanh %131 : vector<2x64xf32>
    %cst_24 = arith.constant 1.000000e+00 : f32
    %133 = vector.broadcast %cst_24 : f32 to vector<2x64xf32>
    %134 = arith.subf %133, %127 : vector<2x64xf32>
    %135 = arith.mulf %134, %132 : vector<2x64xf32>
    %136 = arith.mulf %127, %116 : vector<2x64xf32>
    %137 = arith.addf %135, %136 : vector<2x64xf32>
    %cst_25 = arith.constant dense<0.000000e+00> : vector<2x256xf32>
    %138 = tpu.matmul %137, %0, %cst_25 {dimension_numbers = #tpu.dot_dimension_numbers<[1], [0], [0], [1], [0, 0, 1, 1], [], []>} : vector<2x64xf32>, vector<64x256xf32>, vector<2x256xf32> -> vector<2x256xf32>
    %139 = vector.extract_strided_slice %6 {offsets = [12, 0], sizes = [2, 256], strides = [1, 1]} : vector<18x256xf32> to vector<2x256xf32>
    %140 = arith.addf %138, %139 : vector<2x256xf32>
    %141 = vector.extract_strided_slice %140 {offsets = [0, 0], sizes = [2, 128], strides = [1, 1]} : vector<2x256xf32> to vector<2x128xf32>
    %142 = arith.negf %141 : vector<2x128xf32>
    %143 = math.exp %142 : vector<2x128xf32>
    %cst_26 = arith.constant 1.000000e+00 : f32
    %144 = vector.broadcast %cst_26 : f32 to vector<2x128xf32>
    %145 = arith.addf %144, %143 : vector<2x128xf32>
    %146 = arith.divf %144, %145 : vector<2x128xf32>
    %147 = vector.extract_strided_slice %146 {offsets = [0, 0], sizes = [2, 64], strides = [1, 1]} : vector<2x128xf32> to vector<2x64xf32>
    %148 = vector.extract_strided_slice %146 {offsets = [0, 64], sizes = [2, 64], strides = [1, 1]} : vector<2x128xf32> to vector<2x64xf32>
    %149 = vector.extract_strided_slice %140 {offsets = [0, 192], sizes = [2, 64], strides = [1, 1]} : vector<2x256xf32> to vector<2x64xf32>
    %150 = vector.extract_strided_slice %140 {offsets = [0, 128], sizes = [2, 64], strides = [1, 1]} : vector<2x256xf32> to vector<2x64xf32>
    %151 = arith.mulf %147, %150 : vector<2x64xf32>
    %152 = arith.addf %149, %151 : vector<2x64xf32>
    %153 = math.tanh %152 : vector<2x64xf32>
    %cst_27 = arith.constant 1.000000e+00 : f32
    %154 = vector.broadcast %cst_27 : f32 to vector<2x64xf32>
    %155 = arith.subf %154, %148 : vector<2x64xf32>
    %156 = arith.mulf %155, %153 : vector<2x64xf32>
    %157 = arith.mulf %148, %137 : vector<2x64xf32>
    %158 = arith.addf %156, %157 : vector<2x64xf32>
    %cst_28 = arith.constant dense<0.000000e+00> : vector<2x256xf32>
    %159 = tpu.matmul %158, %0, %cst_28 {dimension_numbers = #tpu.dot_dimension_numbers<[1], [0], [0], [1], [0, 0, 1, 1], [], []>} : vector<2x64xf32>, vector<64x256xf32>, vector<2x256xf32> -> vector<2x256xf32>
    %160 = vector.extract_strided_slice %6 {offsets = [14, 0], sizes = [2, 256], strides = [1, 1]} : vector<18x256xf32> to vector<2x256xf32>
    %161 = arith.addf %159, %160 : vector<2x256xf32>
    %162 = vector.extract_strided_slice %161 {offsets = [0, 0], sizes = [2, 128], strides = [1, 1]} : vector<2x256xf32> to vector<2x128xf32>
    %163 = arith.negf %162 : vector<2x128xf32>
    %164 = math.exp %163 : vector<2x128xf32>
    %cst_29 = arith.constant 1.000000e+00 : f32
    %165 = vector.broadcast %cst_29 : f32 to vector<2x128xf32>
    %166 = arith.addf %165, %164 : vector<2x128xf32>
    %167 = arith.divf %165, %166 : vector<2x128xf32>
    %168 = vector.extract_strided_slice %167 {offsets = [0, 0], sizes = [2, 64], strides = [1, 1]} : vector<2x128xf32> to vector<2x64xf32>
    %169 = vector.extract_strided_slice %167 {offsets = [0, 64], sizes = [2, 64], strides = [1, 1]} : vector<2x128xf32> to vector<2x64xf32>
    %170 = vector.extract_strided_slice %161 {offsets = [0, 192], sizes = [2, 64], strides = [1, 1]} : vector<2x256xf32> to vector<2x64xf32>
    %171 = vector.extract_strided_slice %161 {offsets = [0, 128], sizes = [2, 64], strides = [1, 1]} : vector<2x256xf32> to vector<2x64xf32>
    %172 = arith.mulf %168, %171 : vector<2x64xf32>
    %173 = arith.addf %170, %172 : vector<2x64xf32>
    %174 = math.tanh %173 : vector<2x64xf32>
    %cst_30 = arith.constant 1.000000e+00 : f32
    %175 = vector.broadcast %cst_30 : f32 to vector<2x64xf32>
    %176 = arith.subf %175, %169 : vector<2x64xf32>
    %177 = arith.mulf %176, %174 : vector<2x64xf32>
    %178 = arith.mulf %169, %158 : vector<2x64xf32>
    %179 = arith.addf %177, %178 : vector<2x64xf32>
    %cst_31 = arith.constant dense<0.000000e+00> : vector<2x256xf32>
    %180 = tpu.matmul %179, %0, %cst_31 {dimension_numbers = #tpu.dot_dimension_numbers<[1], [0], [0], [1], [0, 0, 1, 1], [], []>} : vector<2x64xf32>, vector<64x256xf32>, vector<2x256xf32> -> vector<2x256xf32>
    %181 = vector.extract_strided_slice %6 {offsets = [16, 0], sizes = [2, 256], strides = [1, 1]} : vector<18x256xf32> to vector<2x256xf32>
    %182 = arith.addf %180, %181 : vector<2x256xf32>
    %183 = vector.extract_strided_slice %182 {offsets = [0, 0], sizes = [2, 128], strides = [1, 1]} : vector<2x256xf32> to vector<2x128xf32>
    %184 = arith.negf %183 : vector<2x128xf32>
    %185 = math.exp %184 : vector<2x128xf32>
    %cst_32 = arith.constant 1.000000e+00 : f32
    %186 = vector.broadcast %cst_32 : f32 to vector<2x128xf32>
    %187 = arith.addf %186, %185 : vector<2x128xf32>
    %188 = arith.divf %186, %187 : vector<2x128xf32>
    %189 = vector.extract_strided_slice %188 {offsets = [0, 0], sizes = [2, 64], strides = [1, 1]} : vector<2x128xf32> to vector<2x64xf32>
    %190 = vector.extract_strided_slice %188 {offsets = [0, 64], sizes = [2, 64], strides = [1, 1]} : vector<2x128xf32> to vector<2x64xf32>
    %191 = vector.extract_strided_slice %182 {offsets = [0, 192], sizes = [2, 64], strides = [1, 1]} : vector<2x256xf32> to vector<2x64xf32>
    %192 = vector.extract_strided_slice %182 {offsets = [0, 128], sizes = [2, 64], strides = [1, 1]} : vector<2x256xf32> to vector<2x64xf32>
    %193 = arith.mulf %189, %192 : vector<2x64xf32>
    %194 = arith.addf %191, %193 : vector<2x64xf32>
    %195 = math.tanh %194 : vector<2x64xf32>
    %cst_33 = arith.constant 1.000000e+00 : f32
    %196 = vector.broadcast %cst_33 : f32 to vector<2x64xf32>
    %197 = arith.subf %196, %190 : vector<2x64xf32>
    %198 = arith.mulf %197, %195 : vector<2x64xf32>
    %199 = arith.mulf %190, %179 : vector<2x64xf32>
    %200 = arith.addf %198, %199 : vector<2x64xf32>
    %201 = vector.extract_strided_slice %200 {offsets = [0, 32], sizes = [2, 32], strides = [1, 1]} : vector<2x64xf32> to vector<2x32xf32>
    %c0_34 = arith.constant 0 : index
    %c0_35 = arith.constant 0 : index
    %202 = vector.load %arg3[%c0_34, %c0_35] : memref<82x48xf32, #tpu.memory_space<vmem>>, vector<32x48xf32>
    %cst_36 = arith.constant dense<0.000000e+00> : vector<2x48xf32>
    %203 = tpu.matmul %201, %202, %cst_36 {dimension_numbers = #tpu.dot_dimension_numbers<[1], [0], [0], [1], [0, 0, 1, 1], [], []>} : vector<2x32xf32>, vector<32x48xf32>, vector<2x48xf32> -> vector<2x48xf32>
    %204 = vector.extract_strided_slice %203 {offsets = [0, 0], sizes = [2, 16], strides = [1, 1]} : vector<2x48xf32> to vector<2x16xf32>
    %205 = vector.extract_strided_slice %203 {offsets = [0, 16], sizes = [2, 16], strides = [1, 1]} : vector<2x48xf32> to vector<2x16xf32>
    %206 = arith.addf %204, %205 : vector<2x16xf32>
    %207 = vector.extract_strided_slice %203 {offsets = [0, 32], sizes = [2, 16], strides = [1, 1]} : vector<2x48xf32> to vector<2x16xf32>
    %208 = arith.addf %206, %207 : vector<2x16xf32>
    %cst_37 = arith.constant dense<0.000000e+00> : vector<16xf32>
    %209 = vector.multi_reduction <add>, %208, %cst_37 [0] : vector<2x16xf32> to vector<16xf32>
    %210 = vector.shape_cast %209 : vector<16xf32> to vector<1x16xf32>
    %cst_38 = arith.constant 0.166666672 : f32
    %211 = vector.broadcast %cst_38 : f32 to vector<1x16xf32>
    %212 = arith.mulf %210, %211 : vector<1x16xf32>
    %213 = tpu.concatenate %212, %212, %212 in 1 : vector<1x16xf32>, vector<1x16xf32>, vector<1x16xf32> -> vector<1x48xf32>
    %214 = vector.broadcast %213 : vector<1x48xf32> to vector<2x48xf32>
    %215 = arith.subf %203, %214 : vector<2x48xf32>
    %216 = arith.mulf %215, %215 : vector<2x48xf32>
    %217 = vector.extract_strided_slice %216 {offsets = [0, 0], sizes = [2, 16], strides = [1, 1]} : vector<2x48xf32> to vector<2x16xf32>
    %218 = vector.extract_strided_slice %216 {offsets = [0, 16], sizes = [2, 16], strides = [1, 1]} : vector<2x48xf32> to vector<2x16xf32>
    %219 = arith.addf %217, %218 : vector<2x16xf32>
    %220 = vector.extract_strided_slice %216 {offsets = [0, 32], sizes = [2, 16], strides = [1, 1]} : vector<2x48xf32> to vector<2x16xf32>
    %221 = arith.addf %219, %220 : vector<2x16xf32>
    %cst_39 = arith.constant dense<0.000000e+00> : vector<16xf32>
    %222 = vector.multi_reduction <add>, %221, %cst_39 [0] : vector<2x16xf32> to vector<16xf32>
    %223 = vector.shape_cast %222 : vector<16xf32> to vector<1x16xf32>
    %cst_40 = arith.constant 0.166666672 : f32
    %224 = vector.broadcast %cst_40 : f32 to vector<1x16xf32>
    %225 = arith.mulf %223, %224 : vector<1x16xf32>
    %c80 = arith.constant 80 : index
    %c0_41 = arith.constant 0 : index
    %226 = vector.load %arg3[%c80, %c0_41] : memref<82x48xf32, #tpu.memory_space<vmem>>, vector<1x16xf32>
    %c81 = arith.constant 81 : index
    %c0_42 = arith.constant 0 : index
    %227 = vector.load %arg3[%c81, %c0_42] : memref<82x48xf32, #tpu.memory_space<vmem>>, vector<1x16xf32>
    %cst_43 = arith.constant 9.99999974E-6 : f32
    %228 = vector.broadcast %cst_43 : f32 to vector<1x16xf32>
    %229 = arith.addf %225, %228 : vector<1x16xf32>
    %230 = math.rsqrt %229 : vector<1x16xf32>
    %231 = arith.mulf %226, %230 : vector<1x16xf32>
    %232 = tpu.concatenate %231, %231, %231 in 1 : vector<1x16xf32>, vector<1x16xf32>, vector<1x16xf32> -> vector<1x48xf32>
    %233 = tpu.concatenate %227, %227, %227 in 1 : vector<1x16xf32>, vector<1x16xf32>, vector<1x16xf32> -> vector<1x48xf32>
    %234 = vector.broadcast %232 : vector<1x48xf32> to vector<2x48xf32>
    %235 = arith.mulf %215, %234 : vector<2x48xf32>
    %236 = vector.broadcast %233 : vector<1x48xf32> to vector<2x48xf32>
    %237 = arith.addf %235, %236 : vector<2x48xf32>
    %c32 = arith.constant 32 : index
    %c0_44 = arith.constant 0 : index
    %238 = vector.load %arg3[%c32, %c0_44] : memref<82x48xf32, #tpu.memory_space<vmem>>, vector<48x20xf32>
    %cst_45 = arith.constant dense<0.000000e+00> : vector<2x20xf32>
    %239 = tpu.matmul %237, %238, %cst_45 {dimension_numbers = #tpu.dot_dimension_numbers<[1], [0], [0], [1], [0, 0, 1, 1], [], []>} : vector<2x48xf32>, vector<48x20xf32>, vector<2x20xf32> -> vector<2x20xf32>
    %240 = math.tanh %239 : vector<2x20xf32>
    %c0_46 = arith.constant 0 : index
    %c0_47 = arith.constant 0 : index
    %241 = vector.load %arg4[%c0_46, %c0_47] : memref<2x20xf32, #tpu.memory_space<vmem>>, vector<2x20xf32>
    tpu.vector_store %arg4[%c0_46, %c0_47], %240 {strides = array<i32>} : memref<2x20xf32, #tpu.memory_space<vmem>>, vector<2x20xf32>,
    return
  }
}

</mosaic_0001>

<bundles_post_ra>
// kernel: generator_v2_forward.1
= control target key start
LH: loop header
LB: loop body
LE: loop exit
PB: predicated region body
PF: predicated region fallthrough
CT: control target
= control target key end

     0   :  { %v1572_v3 = vmov 0.0   ;;  %vm61_vm0 = vcmask 1043456   ;;  %vm51_vm1 = vcmask 31744   ;;  %vm155_vm2 = vcmask 523264   ;;  %s1576_s15 = smov 32   ;;  %s1577_s16 = smov 96   ;;  %s1920_s2 = inlined_call_operand.vmem [shape: f32[69,256], index: 2, kind: input, shape index: {}]   ;;  %s1921_s0 = inlined_call_operand.vmem [shape: f32[18,4], index: 0, kind: input, shape index: {}]   ;;  %s1922_s1 = inlined_call_operand.vmem [shape: f32[2,64], index: 1, kind: input, shape index: {}]   ;;  %s1923_s3 = inlined_call_operand.vmem [shape: f32[82,48], index: 3, kind: input, shape index: {}]   ;;  %s1924_s4 = inlined_call_operand.vmem [shape: f32[2,20], index: 4, kind: output, shape index: {}]  }
   0x1   :  { %v18_v0 = vld [vmem:[%s1920_s2 + $0x8] sm:$0xff]  ;;  %v20_v1 = vld [vmem:[%s1920_s2 + $0x18] sm:$0xff]  ;;  %v17_v2 = vld [vmem:[%s1920_s2] sm:$0xff]  ;;  %132 = vmatprep.mubr.f32.mxu0 %v1572_v3  ;;  %223 = vmatprep.mubr.f32.mxu1 %v1572_v3  ;;  %v41_v29 = vlaneseq  ;;  %vm1575_vm4 = vmmov 0   ;;  %vm1035_vm5 = vcmask 261120   ;;  %s1578_s17 = smov 112  }
   0x2   :  { %v1616_v4 = vpack.c.bf16 %v20_v1, %v18_v0  ;;  %v19_v5 = vld [vmem:[%s1920_s2 + $0x10] sm:$0xff]  ;;  %v22_v6 = vld [vmem:[%s1920_s2 + $0x28] sm:$0xff]  ;;  %v24_v7 = vld [vmem:[%s1920_s2 + $0x38] sm:$0xff]  ;;  %vm1117_vm6 = vcmask 123904   ;;  %s1579_s18 = smov 16   ;;  %vm1133_vm7 = vcmask 130048  }
   0x3   :  { %v1627_v8 = vpack.c.bf16 %v19_v5, %v17_v2  ;;  %v1629_v9 = vpack.c.bf16 %v24_v7, %v22_v6  ;;  %v21_v10 = vld [vmem:[%s1920_s2 + $0x20] sm:$0xff]  ;;  %v23_v11 = vld [vmem:[%s1920_s2 + $0x30] sm:$0xff]  ;;  %v26_v12 = vld [vmem:[%s1920_s2 + $0x48] sm:$0xff]  ;;  %v42_v30 = vshrl.u32 %v41_v29, 7  ;;  %v152_v61 = vand.u32 127, %v41_v29 }
   0x4   :  { %1344 = vmatprep.subr.bf16.mxu1 %v1616_v4  ;;  %v28_v13 = vld [vmem:[%s1920_s2 + $0x58] sm:$0xff]  ;;  %v1645_v14 = vpack.c.bf16 %v23_v11, %v21_v10  ;;  %v34_v15 = vld [vmem:[%s1920_s2 + $0x88] sm:$0xf]  ;;  %v33_v16 = vld [vmem:[%s1920_s2 + $0x80] sm:$0xf]  ;;  %vm1198_vm8 = vcmask 392192  }
   0x5   :  { %1346 = vmatpush1.bf16.msra.mxu1 %v1627_v8  ;;  %v1654_v17 = vpack.c.bf16 %v28_v13, %v26_v12  ;;  %v25_v18 = vld [vmem:[%s1920_s2 + $0x40] sm:$0xff]  ;;  %v27_v19 = vld [vmem:[%s1920_s2 + $0x50] sm:$0xff]  ;;  %1280 = vmatprep.subr.msk.mxu0 %vm61_vm0, %v34_v15  ;;  %v30_v21 = vld [vmem:[%s1920_s2 + $0x68] sm:$0xff]  ;;  %v1716_v32 = vsub.s32 0, %v42_v30  ;;  %v47_v35 = vsub.s32 1, %v42_v30  ;;  %vm153_vm3 = vcmp.ge.s32.totalorder %v152_v61, 32 }
   0x6   :  { %1348 = vmatprep.subr.bf16.mxu1 %v1629_v9  ;;  %v37_v20 = vld [vmem:[%s1921_s0] sm:$0xff]  ;;  %1281 = vmatpush1.msk.msra.mxu0 %vm61_vm0, %v33_v16  ;;  %v32_v22 = vld [vmem:[%s1920_s2 + $0x78] sm:$0xff]  ;;  %v1674_v23 = vpack.c.bf16 %v27_v19, %v25_v18  ;;  %v31_v26 = vld [vmem:[%s1920_s2 + $0x70] sm:$0xff]  ;;  %vm1273_vm9 = vcmask 156672  }
   0x7   :  { %1282 = vmatmul.mubr.msk.f32.vlgmr.msra.gmra.mrb[0].mxu0 %vm51_vm1, %v37_v20  ;;  %1360 = vmatprep.subr.bf16.mxu0 %v1616_v4  ;;  %v1678_v24 = vpack.c.bf16 %v32_v22, %v30_v21  ;;  %v29_v25 = vld [vmem:[%s1920_s2 + $0x60] sm:$0xff]  ;;  %v38_v49 = vld [vmem:[%s1921_s0 + $0x8] sm:$0xff]  ;;  %v39_v50 = vld [vmem:[%s1921_s0 + $0x10] sm:$0x3] }
   0x8   :  { %1362 = vmatpush1.bf16.msra.mxu0 %v1627_v8  ;;  %138 = vmatprep.mubr.f32.mxu0 %v1572_v3  ;;  %v1689_v27 = vpack.c.bf16 %v31_v26, %v29_v25  ;;  %v1698_v28 = vld [vmem:[%s1922_s1] sm:$0x3]  ;;  %v1279_v34 = vld [vmem:[%s1920_s2 + $0x84] ss:$8 sm:$0x3]  ;;  %s1573_s2 = smov 64  }
   0x9   :  { %1350 = vmatpush1.bf16.msra.mxu1 %v1645_v14  ;;  %1364 = vmatprep.subr.bf16.mxu0 %v1629_v9  ;;  %v1722_v36 = vrot.slane %v1279_v34, %v1716_v32  ;;  %v1724_v37 = vrot.slane %v1279_v34, %v47_v35 }
   0xa   :  { %1352 = vmatprep.subr.bf16.mxu1 %v1654_v17 }
   0xb   :  { %1283 = vmatmul.mubr.msk.f32.gmra.mrb[2].mxu0 %vm51_vm1, %v38_v49 }
   0xc   :  { %1366 = vmatpush1.bf16.msra.mxu0 %v1645_v14  ;;  %144 = vmatprep.mubr.f32.mxu0 %v1572_v3 }
   0xd   :  { %1354 = vmatpush1.bf16.msra.mxu1 %v1674_v23  ;;  %1368 = vmatprep.subr.bf16.mxu0 %v1654_v17 }
   0xe   :  { %1356 = vmatprep.subr.bf16.mxu1 %v1678_v24 }
   0xf   :  { %1284 = vmatmul.mubr.msk.f32.gmra.mrb[4].mxu0 %vm51_vm1, %v39_v50 }
  0x10   :  { %1370 = vmatpush1.bf16.msra.mxu0 %v1674_v23  ;;  %328 = vmatprep.mubr.f32.mxu0 %v1572_v3 }
  0x11   :  { %1358 = vmatpush1.bf16.msra.mxu1 %v1689_v27  ;;  %1372 = vmatprep.subr.bf16.mxu0 %v1678_v24 }
  0x12   :  { %1376 = vmatprep.subr.bf16.mxu1 %v1616_v4 }
  0x14   :  { %1285 = vmatmul.mubr.msk.f32.vlgmr.msra.gmra.mrb[0].mxu1 %vm155_vm2, %v1698_v28  ;;  %1374 = vmatpush1.bf16.msra.mxu0 %v1689_v27 }
  0x15   :  { %1378 = vmatpush1.bf16.msra.mxu1 %v1627_v8  ;;  %428 = vmatprep.mubr.f32.mxu1 %v1572_v3 }
  0x16   :  { %1380 = vmatprep.subr.bf16.mxu1 %v1629_v9  ;;  %1392 = vmatprep.subr.bf16.mxu0 %v1616_v4 }
  0x19   :  { %1382 = vmatpush1.bf16.msra.mxu1 %v1645_v14 }
  0x1a   :  { %1384 = vmatprep.subr.bf16.mxu1 %v1654_v17 }
  0x1d   :  { %1386 = vmatpush1.bf16.msra.mxu1 %v1674_v23 }
  0x1e   :  { %1388 = vmatprep.subr.bf16.mxu1 %v1678_v24 }
  0x21   :  { %1390 = vmatpush1.bf16.msra.mxu1 %v1689_v27 }
  0x22   :  { %1408 = vmatprep.subr.bf16.mxu1 %v1616_v4 }
  0xda   :  { %v134_v31 = vpop.f32.mrb[0].mxu0 }
  0xdb   :  { %v136_v33 = vpop.f32.mrb[1].mxu0  ;;  %v1727_v38 = vadd.f32 %v134_v31, %v1722_v36 }
  0xdc   :  { %v1730_v39 = vadd.f32 %v136_v33, %v1724_v37 }
  0xdd   :  { %v257_v0 = vrot.slane %v1727_v38, 2  ;;  %v358_v29 = vrot.slane %v1727_v38, 4 }
  0xde   :  { %v1748_v59 = vpop.f32.mrb[2].mxu0  ;;  %v258_v2 = vrot.slane %v1730_v39, 2  ;;  %v359_v31 = vrot.slane %v1730_v39, 4 }
  0xdf   :  { %v1750_v60 = vpop.f32.mrb[3].mxu0 }
  0xe7   :  { %v225_v40 = vpop.f32.mrb[0].mxu1 }
  0xe8   :  { %v226_v41 = vadd.f32 %v225_v40, %v1727_v38  ;;  %v227_v42 = vpop.f32.mrb[1].mxu1 }
  0xe9   :  { %v228_v43 = vadd.f32 %v227_v42, %v1730_v39 }
  0xea   :  { %v1286_v44 = vmul.f32 -1.442695, %v226_v41 }
  0xec   :  { %1514 = vpow2.f32 %v1286_v44 }
  0xf6   :  { %v1515_v45 = vpop.eup %1514 }
  0xf7   :  { %v233_v46 = vadd.f32 1.0, %v1515_v45 }
  0xf9   :  { %1516 = vrcp.f32 %v233_v46 }
 0x103   :  { %v1517_v47 = vpop.eup %1516 }
 0x104   :  { %v236_v48 = vmul.f32 %v1517_v47, %v228_v43  ;;  %v243_v54 = vsub.f32 1.0, %v1517_v47 }
 0x106   :  { %238 = vrot.lane.b32.xlu0 %v236_v48, %s1573_s2 }
 0x10a   :  { %245 = vrot.lane.b32.xlu0 %v1698_v28, %s1573_s2 }
 0x178   :  { %v239_v51 = vpop.permute.xlu0 %238 }
 0x179   :  { %v241_v52 = vadd.f32 %v239_v51, %v228_v43 }
 0x17b   :  { %1518 = vtanh.f32 %v241_v52 }
 0x17c   :  { %v246_v53 = vpop.permute.xlu0 %245 }
 0x17d   :  { %v248_v56 = vmul.f32 %v1517_v47, %v246_v53  ;;  %v455_v53 = vrot.slane %v1727_v38, 6 }
 0x185   :  { %v1519_v55 = vpop.eup %1518 }
 0x186   :  { %v244_v57 = vmul.f32 %v1519_v55, %v243_v54  ;;  %v456_v55 = vrot.slane %v1730_v39, 6 }
 0x188   :  { %v249_v58 = vadd.f32 %v248_v56, %v244_v57 }
 0x18a   :  { %251 = vrot.lane.b32.xlu1 %v249_v58, %s1573_s2 }
 0x1fc   :  { %v252_v62 = vpop.permute.xlu1 %251 }
 0x1fd   :  { %v254_v63 = vsel %vm153_vm3, %v1698_v28, %v252_v62 }
 0x1fe   :  { %350 = vrot.lane.b32.xlu0 %v254_v63, %s1573_s2  ;;  %1287 = vmatmul.mubr.msk.f32.vlgmr.msra.gmra.mrb[6].mxu0 %vm155_vm2, %v254_v63 }
 0x1ff   :  { %1394 = vmatpush1.bf16.msra.mxu0 %v1627_v8  ;;  %525 = vmatprep.mubr.f32.mxu0 %v1572_v3 }
 0x200   :  { %1396 = vmatprep.subr.bf16.mxu0 %v1629_v9 }
 0x203   :  { %1398 = vmatpush1.bf16.msra.mxu0 %v1645_v14 }
 0x204   :  { %1400 = vmatprep.subr.bf16.mxu0 %v1654_v17 }
 0x207   :  { %1402 = vmatpush1.bf16.msra.mxu0 %v1674_v23 }
 0x208   :  { %1404 = vmatprep.subr.bf16.mxu0 %v1678_v24 }
 0x20b   :  { %1406 = vmatpush1.bf16.msra.mxu0 %v1689_v27 }
 0x20c   :  { %1424 = vmatprep.subr.bf16.mxu0 %v1616_v4 }
 0x270   :  { %v351_v21 = vpop.permute.xlu0 %350 }
 0x2d1   :  { %v330_v1 = vpop.f32.mrb[6].mxu0 }
 0x2d2   :  { %v331_v5 = vadd.f32 %v330_v1, %v257_v0  ;;  %v332_v6 = vpop.f32.mrb[7].mxu0 }
 0x2d3   :  { %v333_v7 = vadd.f32 %v332_v6, %v258_v2 }
 0x2d4   :  { %v1288_v10 = vmul.f32 -1.442695, %v331_v5 }
 0x2d6   :  { %1520 = vpow2.f32 %v1288_v10 }
 0x2e0   :  { %v1521_v11 = vpop.eup %1520 }
 0x2e1   :  { %v338_v12 = vadd.f32 1.0, %v1521_v11 }
 0x2e3   :  { %1522 = vrcp.f32 %v338_v12  ;;  %v1807_v12 = vadd.f32 %v1748_v59, %v1722_v36 }
 0x2ed   :  { %v1523_v13 = vpop.eup %1522 }
 0x2ee   :  { %v341_v15 = vmul.f32 %v1523_v13, %v333_v7  ;;  %v348_v19 = vsub.f32 1.0, %v1523_v13  ;;  %v353_v25 = vmul.f32 %v1523_v13, %v351_v21  ;;  %v1812_v21 = vadd.f32 %v1750_v60, %v1724_v37 }
 0x2ef   :  { %v647_v60 = vrot.slane %v1807_v12, 2 }
 0x2f0   :  { %343 = vrot.lane.b32.xlu1 %v341_v15, %s1573_s2 }
 0x362   :  { %v344_v16 = vpop.permute.xlu1 %343 }
 0x363   :  { %v346_v18 = vadd.f32 %v344_v16, %v333_v7 }
 0x365   :  { %1524 = vtanh.f32 %v346_v18 }
 0x36f   :  { %v1525_v20 = vpop.eup %1524 }
 0x370   :  { %v349_v22 = vmul.f32 %v1525_v20, %v348_v19 }
 0x372   :  { %v354_v26 = vadd.f32 %v353_v25, %v349_v22 }
 0x374   :  { %356 = vrot.lane.b32.xlu1 %v354_v26, %s1573_s2 }
 0x3e6   :  { %v357_v28 = vpop.permute.xlu1 %356 }
 0x3e7   :  { %1289 = vmatmul.mubr.msk.f32.vlgmr.msra.gmra.mrb[2].mxu1 %vm155_vm2, %v357_v28 }
 0x3e8   :  { %1410 = vmatpush1.bf16.msra.mxu1 %v1627_v8  ;;  %618 = vmatprep.mubr.f32.mxu1 %v1572_v3 }
 0x3e9   :  { %1412 = vmatprep.subr.bf16.mxu1 %v1629_v9 }
 0x3ec   :  { %1414 = vmatpush1.bf16.msra.mxu1 %v1645_v14 }
 0x3ed   :  { %1416 = vmatprep.subr.bf16.mxu1 %v1654_v17 }
 0x3f0   :  { %1418 = vmatpush1.bf16.msra.mxu1 %v1674_v23 }
 0x3f1   :  { %1420 = vmatprep.subr.bf16.mxu1 %v1678_v24 }
 0x3f4   :  { %1422 = vmatpush1.bf16.msra.mxu1 %v1689_v27 }
 0x3f5   :  { %1440 = vmatprep.subr.bf16.mxu1 %v1616_v4 }
 0x4ba   :  { %v430_v30 = vpop.f32.mrb[2].mxu1 }
 0x4bb   :  { %v431_v33 = vadd.f32 %v430_v30, %v358_v29  ;;  %v432_v34 = vpop.f32.mrb[3].mxu1 }
 0x4bc   :  { %v433_v35 = vadd.f32 %v432_v34, %v359_v31 }
 0x4bd   :  { %v1290_v40 = vmul.f32 -1.442695, %v431_v33 }
 0x4bf   :  { %1526 = vpow2.f32 %v1290_v40 }
 0x4c9   :  { %v1527_v41 = vpop.eup %1526 }
 0x4ca   :  { %v438_v42 = vadd.f32 1.0, %v1527_v41 }
 0x4cc   :  { %1528 = vrcp.f32 %v438_v42 }
 0x4d6   :  { %v1529_v43 = vpop.eup %1528 }
 0x4d7   :  { %v441_v44 = vmul.f32 %v1529_v43, %v433_v35  ;;  %v448_v47 = vsub.f32 1.0, %v1529_v43  ;;  %v450_v50 = vmul.f32 %v1529_v43, %v354_v26 }
 0x4d9   :  { %443 = vrot.lane.b32.xlu0 %v441_v44, %s1573_s2 }
 0x54b   :  { %v444_v45 = vpop.permute.xlu0 %443 }
 0x54c   :  { %v446_v46 = vadd.f32 %v444_v45, %v433_v35 }
 0x54e   :  { %1530 = vtanh.f32 %v446_v46  ;;  %v648_v46 = vrot.slane %v1812_v21, 2 }
 0x558   :  { %v1531_v48 = vpop.eup %1530 }
 0x559   :  { %v449_v49 = vmul.f32 %v1531_v48, %v448_v47 }
 0x55b   :  { %v451_v51 = vadd.f32 %v450_v50, %v449_v49 }
 0x55d   :  { %453 = vrot.lane.b32.xlu1 %v451_v51, %s1573_s2 }
 0x5cf   :  { %v454_v52 = vpop.permute.xlu1 %453 }
 0x5d0   :  { %1291 = vmatmul.mubr.msk.f32.vlgmr.msra.gmra.mrb[8].mxu0 %vm155_vm2, %v454_v52 }
 0x5d1   :  { %1426 = vmatpush1.bf16.msra.mxu0 %v1627_v8  ;;  %717 = vmatprep.mubr.f32.mxu0 %v1572_v3 }
 0x5d2   :  { %1428 = vmatprep.subr.bf16.mxu0 %v1629_v9 }
 0x5d5   :  { %1430 = vmatpush1.bf16.msra.mxu0 %v1645_v14 }
 0x5d6   :  { %1432 = vmatprep.subr.bf16.mxu0 %v1654_v17 }
 0x5d9   :  { %1434 = vmatpush1.bf16.msra.mxu0 %v1674_v23 }
 0x5da   :  { %1436 = vmatprep.subr.bf16.mxu0 %v1678_v24 }
 0x5dd   :  { %1438 = vmatpush1.bf16.msra.mxu0 %v1689_v27 }
 0x5de   :  { %1456 = vmatprep.subr.bf16.mxu0 %v1616_v4 }
 0x6a3   :  { %v527_v54 = vpop.f32.mrb[8].mxu0 }
 0x6a4   :  { %v528_v56 = vadd.f32 %v527_v54, %v455_v53  ;;  %v529_v57 = vpop.f32.mrb[9].mxu0 }
 0x6a5   :  { %v530_v58 = vadd.f32 %v529_v57, %v456_v55  ;;  %v744_v57 = vrot.slane %v1807_v12, 4 }
 0x6a6   :  { %v1292_v61 = vmul.f32 -1.442695, %v528_v56 }
 0x6a8   :  { %1532 = vpow2.f32 %v1292_v61 }
 0x6b2   :  { %v1533_v62 = vpop.eup %1532 }
 0x6b3   :  { %v535_v63 = vadd.f32 1.0, %v1533_v62 }
 0x6b5   :  { %1534 = vrcp.f32 %v535_v63 }
 0x6bf   :  { %v1535_v0 = vpop.eup %1534 }
 0x6c0   :  { %v538_v1 = vmul.f32 %v1535_v0, %v530_v58  ;;  %v545_v6 = vsub.f32 1.0, %v1535_v0  ;;  %v547_v10 = vmul.f32 %v1535_v0, %v451_v51 }
 0x6c2   :  { %540 = vrot.lane.b32.xlu0 %v538_v1, %s1573_s2 }
 0x734   :  { %v541_v2 = vpop.permute.xlu0 %540 }
 0x735   :  { %v543_v5 = vadd.f32 %v541_v2, %v530_v58  ;;  %v745_v2 = vrot.slane %v1812_v21, 4 }
 0x737   :  { %1536 = vtanh.f32 %v543_v5 }
 0x741   :  { %v1537_v38 = vpop.eup %1536 }
 0x742   :  { %v546_v7 = vmul.f32 %v1537_v38, %v545_v6 }
 0x744   :  { %v548_v39 = vadd.f32 %v547_v10, %v546_v7 }
 0x746   :  { %550 = vrot.lane.b32.xlu1 %v548_v39, %s1573_s2 }
 0x7b8   :  { %v551_v11 = vpop.permute.xlu1 %550 }
 0x7b9   :  { %1293 = vmatmul.mubr.msk.f32.vlgmr.msra.gmra.mrb[4].mxu1 %vm155_vm2, %v551_v11 }
 0x7ba   :  { %1442 = vmatpush1.bf16.msra.mxu1 %v1627_v8  ;;  %814 = vmatprep.mubr.f32.mxu1 %v1572_v3 }
 0x7bb   :  { %1444 = vmatprep.subr.bf16.mxu1 %v1629_v9 }
 0x7be   :  { %1446 = vmatpush1.bf16.msra.mxu1 %v1645_v14 }
 0x7bf   :  { %1448 = vmatprep.subr.bf16.mxu1 %v1654_v17 }
 0x7c2   :  { %1450 = vmatpush1.bf16.msra.mxu1 %v1674_v23 }
 0x7c3   :  { %1452 = vmatprep.subr.bf16.mxu1 %v1678_v24 }
 0x7c6   :  { %1454 = vmatpush1.bf16.msra.mxu1 %v1689_v27 }
 0x88c   :  { %v620_v13 = vpop.f32.mrb[4].mxu1 }
 0x88d   :  { %v621_v15 = vadd.f32 %v620_v13, %v1807_v12  ;;  %v622_v16 = vpop.f32.mrb[5].mxu1 }
 0x88e   :  { %v623_v22 = vadd.f32 %v622_v16, %v1812_v21 }
 0x88f   :  { %v1294_v18 = vmul.f32 -1.442695, %v621_v15 }
 0x891   :  { %1538 = vpow2.f32 %v1294_v18 }
 0x89b   :  { %v1539_v19 = vpop.eup %1538 }
 0x89c   :  { %v628_v20 = vadd.f32 1.0, %v1539_v19  ;;  %v841_v19 = vrot.slane %v1807_v12, 6 }
 0x89e   :  { %1540 = vrcp.f32 %v628_v20 }
 0x8a8   :  { %v1541_v25 = vpop.eup %1540 }
 0x8a9   :  { %v631_v26 = vmul.f32 %v1541_v25, %v623_v22  ;;  %v638_v29 = vsub.f32 1.0, %v1541_v25  ;;  %v640_v33 = vmul.f32 %v1541_v25, %v548_v39 }
 0x8ab   :  { %633 = vrot.lane.b32.xlu0 %v631_v26, %s1573_s2 }
 0x91d   :  { %v634_v59 = vpop.permute.xlu0 %633 }
 0x91e   :  { %v636_v28 = vadd.f32 %v634_v59, %v623_v22 }
 0x920   :  { %1542 = vtanh.f32 %v636_v28 }
 0x92a   :  { %v1543_v30 = vpop.eup %1542 }
 0x92b   :  { %v639_v31 = vmul.f32 %v1543_v30, %v638_v29 }
 0x92d   :  { %v641_v34 = vadd.f32 %v640_v33, %v639_v31 }
 0x92f   :  { %643 = vrot.lane.b32.xlu1 %v641_v34, %s1573_s2 }
 0x9a1   :  { %v644_v35 = vpop.permute.xlu1 %643 }
 0x9a2   :  { %1295 = vmatmul.mubr.msk.f32.vlgmr.msra.gmra.mrb[10].mxu0 %vm155_vm2, %v644_v35 }
 0x9a3   :  { %1458 = vmatpush1.bf16.msra.mxu0 %v1627_v8  ;;  %911 = vmatprep.mubr.f32.mxu0 %v1572_v3 }
 0x9a4   :  { %1460 = vmatprep.subr.bf16.mxu0 %v1629_v9 }
 0x9a7   :  { %1462 = vmatpush1.bf16.msra.mxu0 %v1645_v14 }
 0x9a8   :  { %1464 = vmatprep.subr.bf16.mxu0 %v1654_v17 }
 0x9ab   :  { %1466 = vmatpush1.bf16.msra.mxu0 %v1674_v23 }
 0x9ac   :  { %1468 = vmatprep.subr.bf16.mxu0 %v1678_v24 }
 0x9af   :  { %1470 = vmatpush1.bf16.msra.mxu0 %v1689_v27 }
 0x9b0   :  { %1472 = vmatprep.subr.bf16.mxu0 %v1616_v4 }
 0xa75   :  { %v719_v40 = vpop.f32.mrb[10].mxu0 }
 0xa76   :  { %v720_v41 = vadd.f32 %v719_v40, %v647_v60  ;;  %v721_v42 = vpop.f32.mrb[11].mxu0 }
 0xa77   :  { %v722_v47 = vadd.f32 %v721_v42, %v648_v46  ;;  %v1028_v46 = vld [vmem:[%s1923_s3] sm:$0xff] }
 0xa78   :  { %v1296_v43 = vmul.f32 -1.442695, %v720_v41 }
 0xa7a   :  { %1544 = vpow2.f32 %v1296_v43 }
 0xa84   :  { %v1545_v44 = vpop.eup %1544 }
 0xa85   :  { %v727_v45 = vadd.f32 1.0, %v1545_v44 }
 0xa87   :  { %1546 = vrcp.f32 %v727_v45  ;;  %v1574_v45 = vmov 0.0|0.0  }
 0xa88   :  { %1487 = vmatprep.subr.bf16.mxu1 %v1574_v45 }
 0xa91   :  { %v1547_v48 = vpop.eup %1546 }
 0xa92   :  { %v730_v49 = vmul.f32 %v1547_v48, %v722_v47  ;;  %v737_v4 = vsub.f32 1.0, %v1547_v48  ;;  %v739_v54 = vmul.f32 %v1547_v48, %v641_v34  ;;  %v1031_v48 = vld [vmem:[%s1923_s3 + $0x18] sm:$0xff] }
 0xa94   :  { %732 = vrot.lane.b32.xlu0 %v730_v49, %s1573_s2 }
 0xb06   :  { %v733_v50 = vpop.permute.xlu0 %732 }
 0xb07   :  { %v735_v51 = vadd.f32 %v733_v50, %v722_v47  ;;  %v1030_v47 = vld [vmem:[%s1923_s3 + $0x10] sm:$0xff] }
 0xb08   :  { %v1491_v49 = vpack.c.bf16 %v1031_v48, %v1030_v47 }
 0xb09   :  { %1548 = vtanh.f32 %v735_v51 }
 0xb13   :  { %v1549_v52 = vpop.eup %1548 }
 0xb14   :  { %v738_v53 = vmul.f32 %v1549_v52, %v737_v4 }
 0xb16   :  { %v740_v55 = vadd.f32 %v739_v54, %v738_v53 }
 0xb18   :  { %742 = vrot.lane.b32.xlu1 %v740_v55, %s1573_s2 }
 0xb8a   :  { %v743_v56 = vpop.permute.xlu1 %742 }
 0xb8b   :  { %1297 = vmatmul.mubr.msk.f32.vlgmr.msra.gmra.mrb[6].mxu1 %vm155_vm2, %v743_v56 }
 0xb8c   :  { %1325 = vmatprep.mubr.msk.f32.mxu1 %vm1575_vm4, %v1572_v3 }
 0xc5e   :  { %v816_v58 = vpop.f32.mrb[6].mxu1 }
 0xc5f   :  { %v817_v61 = vadd.f32 %v816_v58, %v744_v57  ;;  %v818_v62 = vpop.f32.mrb[7].mxu1 }
 0xc60   :  { %v819_v5 = vadd.f32 %v818_v62, %v745_v2 }
 0xc61   :  { %v1298_v63 = vmul.f32 -1.442695, %v817_v61 }
 0xc63   :  { %1550 = vpow2.f32 %v1298_v63 }
 0xc6d   :  { %v1551_v0 = vpop.eup %1550 }
 0xc6e   :  { %v824_v1 = vadd.f32 1.0, %v1551_v0 }
 0xc70   :  { %1552 = vrcp.f32 %v824_v1 }
 0xc7a   :  { %v1553_v6 = vpop.eup %1552 }
 0xc7b   :  { %v827_v38 = vmul.f32 %v1553_v6, %v819_v5  ;;  %v834_v39 = vsub.f32 1.0, %v1553_v6  ;;  %v836_v15 = vmul.f32 %v1553_v6, %v740_v55 }
 0xc7d   :  { %829 = vrot.lane.b32.xlu0 %v827_v38, %s1573_s2 }
 0xcef   :  { %v830_v7 = vpop.permute.xlu0 %829 }
 0xcf0   :  { %v832_v10 = vadd.f32 %v830_v7, %v819_v5 }
 0xcf2   :  { %1554 = vtanh.f32 %v832_v10 }
 0xcfc   :  { %v1555_v11 = vpop.eup %1554 }
 0xcfd   :  { %v835_v13 = vmul.f32 %v1555_v11, %v834_v39 }
 0xcff   :  { %v837_v16 = vadd.f32 %v836_v15, %v835_v13 }
 0xd01   :  { %839 = vrot.lane.b32.xlu1 %v837_v16, %s1573_s2 }
 0xd73   :  { %v840_v18 = vpop.permute.xlu1 %839 }
 0xd74   :  { %1299 = vmatmul.mubr.msk.f32.vlgmr.msra.gmra.mrb[12].mxu0 %vm155_vm2, %v840_v18 }
 0xd75   :  { %1474 = vmatpush1.bf16.msra.mxu0 %v1627_v8  ;;  %1004 = vmatprep.mubr.f32.mxu0 %v1572_v3 }
 0xd76   :  { %1476 = vmatprep.subr.bf16.mxu0 %v1629_v9  ;;  %v842_v9 = vrot.slane %v1812_v21, 6 }
 0xd79   :  { %1478 = vmatpush1.bf16.msra.mxu0 %v1645_v14 }
 0xd7a   :  { %1480 = vmatprep.subr.bf16.mxu0 %v1654_v17 }
 0xd7d   :  { %1482 = vmatpush1.bf16.msra.mxu0 %v1674_v23 }
 0xd7e   :  { %1484 = vmatprep.subr.bf16.mxu0 %v1678_v24 }
 0xd81   :  { %1486 = vmatpush1.bf16.msra.mxu0 %v1689_v27 }
 0xe47   :  { %v913_v20 = vpop.f32.mrb[12].mxu0 }
 0xe48   :  { %v914_v22 = vadd.f32 %v913_v20, %v841_v19  ;;  %v915_v25 = vpop.f32.mrb[13].mxu0  ;;  %v1192_v20 = vld [vmem:[%s1923_s3 + $0x20] sm:$0xff] }
 0xe49   :  { %v916_v14 = vadd.f32 %v915_v25, %v842_v9 }
 0xe4a   :  { %v1300_v8 = vmul.f32 -1.442695, %v914_v22  ;;  %v1193_v22 = vld [vmem:[%s1923_s3 + $0x28] sm:$0xff] }
 0xe4b   :  { %v1494_v25 = vpack.c.bf16 %v1193_v22, %v1192_v20 }
 0xe4c   :  { %1556 = vpow2.f32 %v1300_v8 }
 0xe56   :  { %v1557_v26 = vpop.eup %1556 }
 0xe57   :  { %v921_v59 = vadd.f32 1.0, %v1557_v26 }
 0xe59   :  { %1558 = vrcp.f32 %v921_v59 }
 0xe63   :  { %v1559_v17 = vpop.eup %1558 }
 0xe64   :  { %v924_v28 = vmul.f32 %v1559_v17, %v916_v14  ;;  %v931_v27 = vsub.f32 1.0, %v1559_v17  ;;  %v933_v30 = vmul.f32 %v1559_v17, %v837_v16 }
 0xe66   :  { %926 = vrot.lane.b32.xlu0 %v924_v28, %s1573_s2 }
 0xed8   :  { %v927_v23 = vpop.permute.xlu0 %926 }
 0xed9   :  { %v929_v24 = vadd.f32 %v927_v23, %v916_v14 }
 0xedb   :  { %1560 = vtanh.f32 %v929_v24 }
 0xee5   :  { %v1561_v12 = vpop.eup %1560 }
 0xee6   :  { %v932_v29 = vmul.f32 %v1561_v12, %v931_v27 }
 0xee8   :  { %v934_v31 = vadd.f32 %v933_v30, %v932_v29 }
 0xeea   :  { %936 = vrot.lane.b32.xlu1 %v934_v31, %s1573_s2 }
 0xf5c   :  { %v937_v33 = vpop.permute.xlu1 %936 }
 0xf5d   :  { %1301 = vmatmul.mubr.msk.f32.vlgmr.msra.gmra.mrb[4].mxu0 %vm155_vm2, %v937_v33  ;;  %v1195_v33 = vld [vmem:[%s1923_s3 + $0x38] sm:$0xff] }
0x1030   :  { %v1006_v34 = vpop.f32.mrb[4].mxu0 }
0x1031   :  { %v1502_v21 = vadd.f32 %v1006_v34, %v1722_v36  ;;  %v1008_v35 = vpop.f32.mrb[5].mxu0  ;;  %v1029_v36 = vld [vmem:[%s1923_s3 + $0x8] sm:$0xff] }
0x1032   :  { %v1503_v42 = vadd.f32 %v1008_v35, %v1724_v37  ;;  %v1488_v37 = vpack.c.bf16 %v1029_v36, %v1028_v46  ;;  %v1197_v35 = vld [vmem:[%s1923_s3 + $0x48] sm:$0xff] }
0x1033   :  { %v1302_v60 = vmul.f32 -1.442695, %v1502_v21  ;;  %v1196_v21 = vld [vmem:[%s1923_s3 + $0x40] sm:$0xff] }
0x1034   :  { %1489 = vmatpush3.bf16.msra.mxu1 %v1488_v37 }
0x1035   :  { %1562 = vpow2.f32 %v1302_v60  ;;  %1490 = vmatprep.subr.bf16.mxu1 %v1574_v45  ;;  %v1500_v60 = vpack.c.bf16 %v1197_v35, %v1196_v21 }
0x1038   :  { %1492 = vmatpush3.bf16.msra.mxu1 %v1491_v49 }
0x1039   :  { %1493 = vmatprep.subr.bf16.mxu1 %v1574_v45 }
0x103f   :  { %v1563_v40 = vpop.eup %1562 }
0x1040   :  { %v1014_v41 = vadd.f32 1.0, %v1563_v40  ;;  %v1159_v40 = vld [vmem:[%s1923_s3 + $0x50] sm:$0x1] }
0x1042   :  { %1564 = vrcp.f32 %v1014_v41 }
0x104c   :  { %v1565_v43 = vpop.eup %1564 }
0x104d   :  { %v1017_v44 = vmul.f32 %v1565_v43, %v1503_v42  ;;  %v1024_v4 = vsub.f32 1.0, %v1565_v43  ;;  %v1026_v54 = vmul.f32 %v1565_v43, %v934_v31  ;;  %v1194_v31 = vld [vmem:[%s1923_s3 + $0x30] sm:$0xff] }
0x104e   :  { %v1497_v34 = vpack.c.bf16 %v1195_v33, %v1194_v31  ;;  %v1160_v43 = vld [vmem:[%s1923_s3 + $0x51] sm:$0x1] }
0x104f   :  { %1019 = vrot.lane.b32.xlu0 %v1017_v44, %s1573_s2 }
0x10c1   :  { %v1020_v50 = vpop.permute.xlu0 %1019 }
0x10c2   :  { %v1022_v51 = vadd.f32 %v1503_v42, %v1020_v50 }
0x10c4   :  { %1566 = vtanh.f32 %v1022_v51 }
0x10ce   :  { %v1567_v52 = vpop.eup %1566 }
0x10cf   :  { %v1025_v53 = vmul.f32 %v1567_v52, %v1024_v4 }
0x10d1   :  { %v1027_v55 = vadd.f32 %v1026_v54, %v1025_v53 }
0x10d3   :  { %1033 = vrot.lane.b32.xlu1 %v1027_v55, %s1576_s15 }
0x1145   :  { %v1034_v56 = vpop.permute.xlu1 %1033 }
0x1146   :  { %1326 = vmatmul.mubr.msk.f32.vlgmr.msra.gmra.mrb[8].mxu1 %vm1035_vm5, %v1034_v56 }
0x1147   :  { %1340 = vmatprep.mubr.msk.f32.mxu1 %vm1575_vm4, %v1572_v3  ;;  %1495 = vmatpush3.bf16.msra.mxu1 %v1494_v25 }
0x1148   :  { %1496 = vmatprep.subr.bf16.mxu1 %v1574_v45 }
0x114b   :  { %1498 = vmatpush3.bf16.msra.mxu1 %v1497_v34 }
0x114c   :  { %1499 = vmatprep.subr.bf16.mxu1 %v1574_v45 }
0x114f   :  { %1501 = vmatpush3.bf16.msra.mxu1 %v1500_v60 }
0x1219   :  { %v1104_v57 = vpop.f32.mrb[8].mxu1 }
0x121a   :  { %1113 = vrot.lane.b32.xlu1 %v1104_v57, %s1577_s16  ;;  %1109 = vrot.lane.b32.xlu0 %v1104_v57, %s1578_s17  ;;  %v1327_v58 = vpop.f32.mrb[9].mxu1 }
0x128c   :  { %v1110_v61 = vpop.permute.xlu0 %1109  ;;  %v1114_v63 = vpop.permute.xlu1 %1113 }
0x128d   :  { %v1112_v62 = vadd.f32 %v1110_v61, %v1104_v57 }
0x128f   :  { %v1116_v0 = vadd.f32 %v1114_v63, %v1112_v62 }
0x1291   :  { %v1118_v1 = vsel %vm1117_vm6, %v1116_v0, 0.0 }
0x1292   :  { %v1119_v2 = vrot.slane %v1118_v1, 4 }
0x1294   :  { %v1120_v5 = vadd.f32 %v1119_v2, %v1118_v1 }
0x1296   :  { %v1121_v6 = vrot.slane %v1120_v5, 2 }
0x1298   :  { %v1122_v38 = vadd.f32 %v1121_v6, %v1120_v5 }
0x129a   :  { %v1123_v7 = vrot.slane %v1122_v38, 1 }
0x129c   :  { %v1124_v10 = vadd.f32 %v1123_v7, %v1122_v38 }
0x129e   :  { %v1125_v3 = vmul.f32 0.16666667, %v1124_v10 }
0x12a0   :  { %1130 = vrot.lane.b32.xlu1 %v1125_v3, %s1576_s15  ;;  %1127 = vrot.lane.b32.xlu0 %v1125_v3, %s1579_s18 }
0x1312   :  { %v1131_v39 = vpop.permute.xlu1 %1130  ;;  %v1128_v11 = vpop.permute.xlu0 %1127 }
0x1313   :  { %v1134_v13 = vsel %vm1133_vm7, %v1125_v3, %v1128_v11 }
0x1314   :  { %v1135_v15 = vsel %vm1035_vm5, %v1134_v13, %v1131_v39 }
0x1315   :  { %v1139_v16 = vrot.slane %v1135_v15, %v1716_v32 }
0x1317   :  { %v1140_v18 = vsub.f32 %v1104_v57, %v1139_v16 }
0x1319   :  { %v1141_v19 = vmul.f32 %v1140_v18, %v1140_v18 }
0x131b   :  { %1147 = vrot.lane.b32.xlu1 %v1141_v19, %s1577_s16  ;;  %1143 = vrot.lane.b32.xlu0 %v1141_v19, %s1578_s17 }
0x138d   :  { %v1144_v8 = vpop.permute.xlu0 %1143  ;;  %v1148_v59 = vpop.permute.xlu1 %1147 }
0x138e   :  { %v1146_v26 = vadd.f32 %v1144_v8, %v1141_v19 }
0x1390   :  { %v1150_v9 = vadd.f32 %v1148_v59, %v1146_v26 }
0x1392   :  { %v1151_v14 = vsel %vm1117_vm6, %v1150_v9, 0.0 }
0x1393   :  { %v1152_v17 = vrot.slane %v1151_v14, 4 }
0x1395   :  { %v1153_v28 = vadd.f32 %v1152_v17, %v1151_v14 }
0x1397   :  { %v1154_v23 = vrot.slane %v1153_v28, 2 }
0x1399   :  { %v1155_v24 = vadd.f32 %v1154_v23, %v1153_v28 }
0x139b   :  { %v1156_v27 = vrot.slane %v1155_v24, 1 }
0x139d   :  { %v1157_v12 = vadd.f32 %v1156_v27, %v1155_v24 }
0x139f   :  { %v1158_v29 = vmul.f32 0.16666667, %v1157_v12 }
0x13a1   :  { %v1161_v30 = vadd.f32 1e-05, %v1158_v29 }
0x13a3   :  { %1568 = vrsqrt.f32 %v1161_v30 }
0x13ad   :  { %v1569_v41 = vpop.eup %1568 }
0x13ae   :  { %v1163_v42 = vmul.f32 %v1569_v41, %v1159_v40 }
0x13b0   :  { %1168 = vrot.lane.b32.xlu1 %v1163_v42, %s1576_s15  ;;  %1165 = vrot.lane.b32.xlu0 %v1163_v42, %s1579_s18 }
0x13b4   :  { %1174 = vrot.lane.b32.xlu0 %v1160_v43, %s1579_s18  ;;  %1177 = vrot.lane.b32.xlu1 %v1160_v43, %s1576_s15 }
0x1422   :  { %v1169_v44 = vpop.permute.xlu1 %1168  ;;  %v1166_v45 = vpop.permute.xlu0 %1165 }
0x1423   :  { %v1171_v46 = vsel %vm1133_vm7, %v1163_v42, %v1166_v45 }
0x1424   :  { %v1172_v36 = vsel %vm1035_vm5, %v1171_v46, %v1169_v44 }
0x1425   :  { %v1185_v47 = vrot.slane %v1172_v36, %v1716_v32 }
0x1426   :  { %v1175_v37 = vpop.permute.xlu0 %1174  ;;  %v1178_v48 = vpop.permute.xlu1 %1177 }
0x1427   :  { %v1180_v49 = vsel %vm1133_vm7, %v1160_v43, %v1175_v37  ;;  %v1186_v51 = vmul.f32 %v1185_v47, %v1140_v18 }
0x1428   :  { %v1181_v50 = vsel %vm1035_vm5, %v1180_v49, %v1178_v48 }
0x1429   :  { %v1190_v4 = vrot.slane %v1181_v50, %v1716_v32 }
0x142b   :  { %v1191_v52 = vadd.f32 %v1190_v4, %v1186_v51 }
0x142d   :  { %1341 = vmatmul.mubr.msk.f32.vlgmr.msra.gmra.mrb[10].mxu1 %vm1198_vm8, %v1191_v52 }
0x1500   :  { %v1268_v53 = vpop.f32.mrb[10].mxu1 }
0x1501   :  { %1570 = vtanh.f32 %v1268_v53  ;;  %v1342_v54 = vpop.f32.mrb[11].mxu1 }
0x150b   :  { %v1571_v55 = vpop.eup %1570 }
0x150c   :  { %1274 = vst.msk [vmem:[%s1924_s4] sm:$0x3] %vm1273_vm9, %v1571_v55 }

</bundles_post_ra>
